<compile_context>
chip_gen: v6e
topology: v6e:2x2x1
jax: 0.10.0
libtpu: 0.0.40
codegen_flags: <defaults>
</compile_context>

<pallas_src>
import math

import numpy as np

import jax
import jax.numpy as jnp
from jax import lax
from jax.experimental import pallas as pl
from jax.experimental.pallas import tpu as pltpu


# ---------------------------------------------------------------------------
# Projection kernel: q = x @ (Wq * C**-0.5), k = x @ Wk, v = x @ Wv,
# computed once over all (B*T) rows (hoisted out of the attention loop).
# ---------------------------------------------------------------------------
def _qkv_proj_kernel(x_ref, wq_ref, wk_ref, wv_ref, q_ref, k_ref, v_ref):
    x = x_ref[...]
    q_ref[...] = jnp.dot(x, wq_ref[...],
                         preferred_element_type=jnp.float32).astype(q_ref.dtype)
    k_ref[...] = jnp.dot(x, wk_ref[...],
                         preferred_element_type=jnp.float32).astype(k_ref.dtype)
    v_ref[...] = jnp.dot(x, wv_ref[...],
                         preferred_element_type=jnp.float32).astype(v_ref.dtype)


def _project_qkv(x2d, w_q, w_k, w_v, *, max_rows=512):
    n, c = x2d.shape
    h = w_q.shape[1]
    if n <= max_rows:
        tm = n
    else:
        tm = max_rows
        while tm >= 8 and n % tm != 0:
            tm //= 2
        if n % tm != 0:
            raise ValueError(f"B*T={n} must be divisible by a row tile >= 8")

    out = jax.ShapeDtypeStruct((n, h), x2d.dtype)
    return pl.pallas_call(
        _qkv_proj_kernel,
        out_shape=(out, out, out),
        grid_spec=pltpu.PrefetchScalarGridSpec(
            num_scalar_prefetch=0,
            grid=(n // tm,),
            in_specs=[
                pl.BlockSpec((tm, c), lambda i: (i, 0)),
                pl.BlockSpec((c, h), lambda i: (0, 0)),
                pl.BlockSpec((c, h), lambda i: (0, 0)),
                pl.BlockSpec((c, h), lambda i: (0, 0)),
            ],
            out_specs=[
                pl.BlockSpec((tm, h), lambda i: (i, 0)),
                pl.BlockSpec((tm, h), lambda i: (i, 0)),
                pl.BlockSpec((tm, h), lambda i: (i, 0)),
            ],
        ),
        compiler_params=pltpu.CompilerParams(
            dimension_semantics=("parallel",),
        ),
    )(x2d, w_q, w_k, w_v)


# ---------------------------------------------------------------------------
# Flash-attention kernel over a lower-triangular (qi, ki) block schedule.
# ---------------------------------------------------------------------------
def _flash_kernel(qi_ref, ki_ref, q_ref, k_ref, v_ref, o_ref,
                  m_ref, l_ref, acc_ref):
    # qi_ref/ki_ref: scalar-prefetched schedule (SMEM), indexed by the step id.
    # q_ref: (1, tq, H) scaled query block   k_ref/v_ref: (1, tk, H)
    # o_ref: (1, tq, H)
    # scratch: m (tq,1), l (tq,1), acc (tq,H), all f32.
    t = pl.program_id(1)
    qi = qi_ref[t]
    ki = ki_ref[t]

    @pl.when(ki == 0)
    def _init():
        m_ref[...] = jnp.full(m_ref.shape, -jnp.inf, dtype=m_ref.dtype)
        l_ref[...] = jnp.zeros(l_ref.shape, dtype=l_ref.dtype)
        acc_ref[...] = jnp.zeros(acc_ref.shape, dtype=acc_ref.dtype)

    q = q_ref[0]                                   # (tq, H), already scaled
    k = k_ref[0]                                   # (tk, H)
    # Contract over the head dim directly (no k.T materialization via XLU);
    # operands stay in their native dtype, accumulation in f32.
    s = lax.dot_general(q, k, (((1,), (1,)), ((), ())),
                        preferred_element_type=jnp.float32)   # (tq, tk)

    def online_softmax_update(s_blk):
        m_prev = m_ref[...]                                        # (tq, 1)
        m_new = jnp.maximum(m_prev, jnp.max(s_blk, axis=-1, keepdims=True))
        alpha = jnp.exp(m_prev - m_new)
        p = jnp.exp(s_blk - m_new)                                 # (tq, tk)
        l_ref[...] = alpha * l_ref[...] + jnp.sum(p, axis=-1, keepdims=True)
        acc_ref[...] = alpha * acc_ref[...] + jnp.dot(
            p.astype(v_ref.dtype), v_ref[0],
            preferred_element_type=jnp.float32)                    # (tq, H)
        m_ref[...] = m_new

    # With tq == tk, only the diagonal block straddles the causal boundary.
    is_diag = qi == ki

    @pl.when(is_diag)
    def _masked_update():
        tq, tk = s.shape
        r = lax.broadcasted_iota(jnp.int32, (tq, tk), 0)
        c = lax.broadcasted_iota(jnp.int32, (tq, tk), 1)
        online_softmax_update(jnp.where(c <= r, s, -jnp.inf))

    @pl.when(jnp.logical_not(is_diag))
    def _unmasked_update():
        online_softmax_update(s)

    # The diagonal block is the last kv block of every q row in the schedule.
    @pl.when(is_diag)
    def _finalize():
        # Exact divide: runs once per q-block on a (tq, H) tile -> negligible.
        o_ref[0] = (acc_ref[...] / l_ref[...]).astype(o_ref.dtype)


def head_forward(x, w_key, w_query, w_value, *, block_q=256, block_k=256):
    """x: (B, T, C); w_*: (C, H). Returns (B, T, H). Eval-mode (no dropout)."""
    B, T, C = x.shape
    H = w_key.shape[1]
    assert block_q == block_k, "triangular schedule requires block_q == block_k"

    # Pick the largest tile <= block_q that divides T (or T itself).
    tile = min(block_q, T)
    if T % tile != 0:
        while tile >= 8 and T % tile != 0:
            tile //= 2
    assert T % tile == 0 and (tile == T or tile % 8 == 0), \
        "T must be divisible by a tile that is a multiple of 8"
    tq = tk = tile
    nq = T // tq

    # Host-side weight prep: fold the C**-0.5 scale into the query weight.
    scale = jnp.asarray(C, jnp.float32) ** jnp.float32(-0.5)
    w_q = (w_query.astype(jnp.float32) * scale).astype(w_query.dtype)

    # Hoisted projections: one pass over x, never recomputed in the flash loop.
    q2, k2, v2 = _project_qkv(x.reshape(B * T, C), w_q, w_key, w_value)
    q = q2.reshape(B, T, H)
    k = k2.reshape(B, T, H)
    v = v2.reshape(B, T, H)

    # Lower-triangular (q-block, kv-block) schedule: upper-triangular blocks
    # never appear, so they cost neither DMA nor grid steps.
    qi_np = np.concatenate([np.full(i + 1, i, np.int32) for i in range(nq)])
    ki_np = np.concatenate([np.arange(i + 1, dtype=np.int32) for i in range(nq)])
    n_steps = int(qi_np.size)                      # nq * (nq + 1) // 2
    qi_sched = jnp.asarray(qi_np)
    ki_sched = jnp.asarray(ki_np)

    itemsize = jnp.dtype(x.dtype).itemsize
    cost = pl.CostEstimate(
        flops=int(2 * B * T * T * H),                       # causal qk + pv MACs
        transcendentals=int(B * T * T // 2 + B * T),        # softmax exp()
        bytes_accessed=int(
            B * T * H * itemsize                            # q (once per row)
            + 2 * B * n_steps * tk * H * itemsize           # k + v block reads
            + B * T * H * itemsize),                        # output
    )

    return pl.pallas_call(
        _flash_kernel,
        out_shape=jax.ShapeDtypeStruct((B, T, H), x.dtype),
        grid_spec=pltpu.PrefetchScalarGridSpec(
            num_scalar_prefetch=2,
            grid=(B, n_steps),
            in_specs=[
                pl.BlockSpec((1, tq, H), lambda b, t, qs, ks: (b, qs[t], 0)),  # q
                pl.BlockSpec((1, tk, H), lambda b, t, qs, ks: (b, ks[t], 0)),  # k
                pl.BlockSpec((1, tk, H), lambda b, t, qs, ks: (b, ks[t], 0)),  # v
            ],
            out_specs=pl.BlockSpec((1, tq, H), lambda b, t, qs, ks: (b, qs[t], 0)),
            scratch_shapes=[
                pltpu.VMEM((tq, 1), jnp.float32),    # running max
                pltpu.VMEM((tq, 1), jnp.float32),    # running denominator
                pltpu.VMEM((tq, H), jnp.float32),    # output accumulator
            ],
        ),
        compiler_params=pltpu.CompilerParams(
            dimension_semantics=("parallel", "arbitrary"),
        ),
        cost_estimate=cost,
    )(qi_sched, ki_sched, q, k, v)


def head_reference(x, w_key, w_query, w_value):
    """Plain-JAX reference mirroring the PyTorch forward (eval mode)."""
    B, T, C = x.shape
    k = x @ w_key
    q = x @ w_query
    v = x @ w_value
    wei = (q @ jnp.swapaxes(k, -2, -1)) * (C ** -0.5)
    tril = jnp.tril(jnp.ones((T, T), dtype=bool))
    wei = jnp.where(tril[None, :, :], wei, -jnp.inf)
    wei = jax.nn.softmax(wei, axis=-1)
    return wei @ v


if __name__ == "__main__":
    # Shapes consistent with the module: block_size=T=8, n_embd=C=32, head_size=16.
    B, T, C, H = 2, 8, 32, 16

    key = jax.random.PRNGKey(0)
    kx, kk, kq, kv, kx2 = jax.random.split(key, 5)

    x = jax.random.normal(kx, (B, T, C), dtype=jnp.float32)
    bound = 1.0 / math.sqrt(C)
    w_key = jax.random.uniform(kk, (C, H), jnp.float32, -bound, bound)
    w_query = jax.random.uniform(kq, (C, H), jnp.float32, -bound, bound)
    w_value = jax.random.uniform(kv, (C, H), jnp.float32, -bound, bound)

    out = head_forward(x, w_key, w_query, w_value)
    jax.block_until_ready(out)
    ref = head_reference(x, w_key, w_query, w_value)
    assert out.shape == (B, T, H)
    # Tolerance covers MXU-vs-XLA default f32 matmul precision differences
    # (approx reciprocal was removed, so this is 2x tighter than before).
    assert jnp.allclose(out, ref, atol=5e-3, rtol=5e-3), "mismatch vs reference (T=8)"

    # Multi-block check: several q/kv blocks exercise the online-softmax
    # accumulation, triangular schedule, diagonal-only masking, and finalize.
    T2 = 32
    x2 = jax.random.normal(kx2, (B, T2, C), dtype=jnp.float32)
    out2 = head_forward(x2, w_key, w_query, w_value, block_q=8, block_k=8)
    jax.block_until_ready(out2)
    ref2 = head_reference(x2, w_key, w_query, w_value)
    assert jnp.allclose(out2, ref2, atol=5e-3, rtol=5e-3), "mismatch vs reference (T=32)"

    print("KERNEL_OK")
</pallas_src>

<mosaic_0001>
module attributes {stable_mosaic.version = 11 : i64} {
  func.func @_qkv_proj_kernel(%arg0: i32, %arg1: memref<16x32xf32, #tpu.memory_space<vmem>>, %arg2: memref<32x16xf32, #tpu.memory_space<vmem>>, %arg3: memref<32x16xf32, #tpu.memory_space<vmem>>, %arg4: memref<32x16xf32, #tpu.memory_space<vmem>>, %arg5: memref<16x16xf32, #tpu.memory_space<vmem>>, %arg6: memref<16x16xf32, #tpu.memory_space<vmem>>, %arg7: memref<16x16xf32, #tpu.memory_space<vmem>>) attributes {dimension_semantics = [#tpu.dimension_semantics<parallel>], iteration_bounds = array<i64: 1>, scalar_prefetch = 0 : i64, scratch_operands = 0 : i64, tpu.core_type = #tpu.core_type<tc>, window_params = [{transform_indices = @transform_0, window_bounds = array<i64: 16, 32>}, {pipeline_mode = #tpu.pipeline_mode<synchronous>, transform_indices = @transform_1, window_bounds = array<i64: 32, 16>}, {pipeline_mode = #tpu.pipeline_mode<synchronous>, transform_indices = @transform_2, window_bounds = array<i64: 32, 16>}, {pipeline_mode = #tpu.pipeline_mode<synchronous>, transform_indices = @transform_3, window_bounds = array<i64: 32, 16>}, {transform_indices = @transform_4, window_bounds = array<i64: 16, 16>}, {transform_indices = @transform_5, window_bounds = array<i64: 16, 16>}, {transform_indices = @transform_6, window_bounds = array<i64: 16, 16>}]} {
    %c0 = arith.constant 0 : index
    %c0_0 = arith.constant 0 : index
    %0 = vector.load %arg1[%c0, %c0_0] : memref<16x32xf32, #tpu.memory_space<vmem>>, vector<16x32xf32>
    %c0_1 = arith.constant 0 : index
    %c0_2 = arith.constant 0 : index
    %1 = vector.load %arg2[%c0_1, %c0_2] : memref<32x16xf32, #tpu.memory_space<vmem>>, vector<32x16xf32>
    %cst = arith.constant dense<0.000000e+00> : vector<16x16xf32>
    %2 = tpu.matmul %0, %1, %cst {dimension_numbers = #tpu.dot_dimension_numbers<[1], [0], [0], [1], [0, 0, 1, 1], [], []>} : vector<16x32xf32>, vector<32x16xf32>, vector<16x16xf32> -> vector<16x16xf32>
    %c0_3 = arith.constant 0 : index
    %c0_4 = arith.constant 0 : index
    %3 = vector.load %arg5[%c0_3, %c0_4] : memref<16x16xf32, #tpu.memory_space<vmem>>, vector<16x16xf32>
    tpu.vector_store %arg5[%c0_3, %c0_4], %2 {strides = array<i32>} : memref<16x16xf32, #tpu.memory_space<vmem>>, vector<16x16xf32>,
    %c0_5 = arith.constant 0 : index
    %c0_6 = arith.constant 0 : index
    %4 = vector.load %arg3[%c0_5, %c0_6] : memref<32x16xf32, #tpu.memory_space<vmem>>, vector<32x16xf32>
    %cst_7 = arith.constant dense<0.000000e+00> : vector<16x16xf32>
    %5 = tpu.matmul %0, %4, %cst_7 {dimension_numbers = #tpu.dot_dimension_numbers<[1], [0], [0], [1], [0, 0, 1, 1], [], []>} : vector<16x32xf32>, vector<32x16xf32>, vector<16x16xf32> -> vector<16x16xf32>
    %c0_8 = arith.constant 0 : index
    %c0_9 = arith.constant 0 : index
    %6 = vector.load %arg6[%c0_8, %c0_9] : memref<16x16xf32, #tpu.memory_space<vmem>>, vector<16x16xf32>
    tpu.vector_store %arg6[%c0_8, %c0_9], %5 {strides = array<i32>} : memref<16x16xf32, #tpu.memory_space<vmem>>, vector<16x16xf32>,
    %c0_10 = arith.constant 0 : index
    %c0_11 = arith.constant 0 : index
    %7 = vector.load %arg4[%c0_10, %c0_11] : memref<32x16xf32, #tpu.memory_space<vmem>>, vector<32x16xf32>
    %cst_12 = arith.constant dense<0.000000e+00> : vector<16x16xf32>
    %8 = tpu.matmul %0, %7, %cst_12 {dimension_numbers = #tpu.dot_dimension_numbers<[1], [0], [0], [1], [0, 0, 1, 1], [], []>} : vector<16x32xf32>, vector<32x16xf32>, vector<16x16xf32> -> vector<16x16xf32>
    %c0_13 = arith.constant 0 : index
    %c0_14 = arith.constant 0 : index
    %9 = vector.load %arg7[%c0_13, %c0_14] : memref<16x16xf32, #tpu.memory_space<vmem>>, vector<16x16xf32>
    tpu.vector_store %arg7[%c0_13, %c0_14], %8 {strides = array<i32>} : memref<16x16xf32, #tpu.memory_space<vmem>>, vector<16x16xf32>,
    return
  }
  func.func @transform_0(%arg0: i32) -> (i32, i32) {
    %c0_i32 = arith.constant 0 : i32
    %c0_i32_0 = arith.constant 0 : i32
    return %arg0, %c0_i32 : i32, i32
  }
  func.func @transform_1(%arg0: i32) -> (i32, i32) {
    %c0_i32 = arith.constant 0 : i32
    %c0_i32_0 = arith.constant 0 : i32
    %c0_i32_1 = arith.constant 0 : i32
    return %c0_i32, %c0_i32_0 : i32, i32
  }
  func.func @transform_2(%arg0: i32) -> (i32, i32) {
    %c0_i32 = arith.constant 0 : i32
    %c0_i32_0 = arith.constant 0 : i32
    %c0_i32_1 = arith.constant 0 : i32
    return %c0_i32, %c0_i32_0 : i32, i32
  }
  func.func @transform_3(%arg0: i32) -> (i32, i32) {
    %c0_i32 = arith.constant 0 : i32
    %c0_i32_0 = arith.constant 0 : i32
    %c0_i32_1 = arith.constant 0 : i32
    return %c0_i32, %c0_i32_0 : i32, i32
  }
  func.func @transform_4(%arg0: i32) -> (i32, i32) {
    %c0_i32 = arith.constant 0 : i32
    %c0_i32_0 = arith.constant 0 : i32
    return %arg0, %c0_i32 : i32, i32
  }
  func.func @transform_5(%arg0: i32) -> (i32, i32) {
    %c0_i32 = arith.constant 0 : i32
    %c0_i32_0 = arith.constant 0 : i32
    return %arg0, %c0_i32 : i32, i32
  }
  func.func @transform_6(%arg0: i32) -> (i32, i32) {
    %c0_i32 = arith.constant 0 : i32
    %c0_i32_0 = arith.constant 0 : i32
    return %arg0, %c0_i32 : i32, i32
  }
}

</mosaic_0001>

<bundles_post_ra>
// kernel: tpu_custom_call.1
= control target key start
LH: loop header
LB: loop body
LE: loop exit
PB: predicated region body
PF: predicated region fallthrough
CT: control target
= control target key end

     0   :  { %12 = vsyncpa [#allocation3], 0  ;;  %vm28_vm0 = vcmask 261120   ;;  %s560_s0 = inlined_call_operand.vmem [shape: f32[16,32], index: 0, kind: input, shape index: {}]   ;;  %s561_s1 = inlined_call_operand.vmem [shape: f32[32,16], index: 1, kind: input, shape index: {}]   ;;  %s562_s2 = inlined_call_operand.vmem [shape: f32[32,16], index: 2, kind: input, shape index: {}]   ;;  %s563_s3 = inlined_call_operand.vmem [shape: f32[32,16], index: 3, kind: input, shape index: {}]   ;;  %s564_s4 = inlined_call_operand.hbm [shape: f32[16,16], index: 4, kind: output, shape index: {0}]   ;;  %s565_s5 = inlined_call_operand.hbm [shape: f32[16,16], index: 5, kind: output, shape index: {1}]   ;;  %s566_s6 = inlined_call_operand.hbm [shape: f32[16,16], index: 6, kind: output, shape index: {2}]  }
   0x1   :  { %v27_v0 = vld [vmem:[%s561_s1 + $0x18] sm:$0xff]  ;;  %v26_v1 = vld [vmem:[%s561_s1 + $0x10] sm:$0xff]  ;;  %v22_v3 = vld [vmem:[%s560_s0] sm:$0xff] }
   0x2   :  { %346 = vmatprep.subr.mxu0 %v27_v0  ;;  %v116_v2 = vld [vmem:[%s562_s2 + $0x18] sm:$0xff]  ;;  %v25_v4 = vld [vmem:[%s561_s1 + $0x8] sm:$0xff]  ;;  %v115_v5 = vld [vmem:[%s562_s2 + $0x10] sm:$0xff]  ;;  %354 = vmatprep.mubr.msk.f32.mxu0 %vm28_vm0, %v22_v3 }
   0x3   :  { %347 = vmatpush3.msra.mxu0 %v27_v0  ;;  %357 = vmatprep.subr.mxu1 %v116_v2  ;;  %v24_v6 = vld [vmem:[%s561_s1] sm:$0xff]  ;;  %v114_v7 = vld [vmem:[%s562_s2 + $0x8] sm:$0xff] }
   0x4   :  { %348 = vmatprep.subr.mxu0 %v26_v1  ;;  %358 = vmatpush3.msra.mxu1 %v116_v2 }
   0x5   :  { %349 = vmatpush3.msra.mxu0 %v26_v1 }
   0x6   :  { %13 = vsyncpa [#allocation5], 0  ;;  %350 = vmatprep.subr.mxu0 %v25_v4  ;;  %359 = vmatprep.subr.mxu1 %v115_v5  ;;  %v23_v8 = vld [vmem:[%s560_s0 + $0x8] sm:$0xff]  ;;  %v197_v9 = vld [vmem:[%s563_s3 + $0x18] sm:$0xff]  ;;  %vm110_vm1 = vcmask 130048   ;;  %s448_s22 = smov [#allocation2]  }
   0x7   :  { %351 = vmatpush3.msra.mxu0 %v25_v4  ;;  %360 = vmatpush3.msra.mxu1 %v115_v5  ;;  %v113_v10 = vld [vmem:[%s562_s2] sm:$0xff]  ;;  %v196_v11 = vld [vmem:[%s563_s3 + $0x10] sm:$0xff]  ;;  %v195_v12 = vld [vmem:[%s563_s3 + $0x8] sm:$0xff]  ;;  %s280_s23 = sshll.u32 %s448_s22, 4  ;;  %s449_s24 = smov [#allocation4]   ;;  %s281_s23 = int_to_ptr.vmem [resolvable:$true] %s280_s23 }
   0x8   :  { %352 = vmatprep.subr.mxu0 %v24_v6  ;;  %361 = vmatprep.subr.mxu1 %v114_v7  ;;  %v194_v13 = vld [vmem:[%s563_s3] sm:$0xff]  ;;  %s292_s3 = sshll.u32 %s449_s24, 4  ;;  %s384_s25 = scalar_lea.vmem %s281_s23, 256  ;;  %s293_s3 = int_to_ptr.vmem [resolvable:$true] %s292_s3 }
   0x9   :  { %353 = vmatpush3.msra.mxu0 %v24_v6  ;;  %362 = vmatpush3.msra.mxu1 %v114_v7  ;;  %p385_p0 = scmp.ne.s32.totalorder %s281_s23, %s384_s25  ;;  %p389_p1 = scmp.lt.s32.totalorder %s281_s23, %s281_s23 }
   0xa   :  { %355 = vmatmul.mubr.msk.f32.vlgmr.msra.gmra.mxu0 %vm28_vm0, %v23_v8  ;;  %368 = vmatprep.subr.mxu0 %v197_v9  ;;  %p390_p2 = scmp.lt.s32.totalorder %s384_s25, %s384_s25 }
   0xb   :  { %369 = vmatpush3.msra.mxu0 %v197_v9  ;;  %363 = vmatprep.subr.mxu1 %v113_v10 }
   0xc   :  { %370 = vmatprep.subr.mxu0 %v196_v11  ;;  %364 = vmatpush3.msra.mxu1 %v113_v10  ;;  %p391_p3 = por %p390_p2, %p389_p1 }
   0xd   :  { %371 = vmatpush3.msra.mxu0 %v196_v11  ;;  %365 = vmatprep.mubr.msk.f32.mxu1 %vm28_vm0, %v22_v3 }
   0xe   :  { %372 = vmatprep.subr.mxu0 %v195_v12  ;;  %366 = vmatmul.mubr.msk.f32.vlgmr.msra.gmra.mxu1 %vm28_vm0, %v23_v8  ;;  %p392_p4 = pnand %p391_p3, %p385_p0 }
   0xf   :  { %373 = vmatpush3.msra.mxu0 %v195_v12  ;;  %376 = vmatprep.mubr.msk.f32.mxu0 %vm28_vm0, %v22_v3 }
  0x10   :  { %374 = vmatprep.subr.mxu0 %v194_v13 }
  0x11   :  { %375 = vmatpush3.msra.mxu0 %v194_v13 }
  0x12   :  { %377 = vmatmul.mubr.msk.f32.vlgmr.msra.gmra.mxu0 %vm28_vm0, %v23_v8 }
  0xca   :  { %v356_v14 = vpop.f32.mrf.mxu0 }
  0xcb   :  { %112 = vst.msk [vmem:[#allocation2 + $0x8] sm:$0xff] %vm110_vm1, %v356_v14 }
  0xcc   :  { %v101_v15 = vpop.f32.mrf.mxu0 }
  0xcd   :  { %111 = vst.msk [vmem:[#allocation2] sm:$0xff] %vm110_vm1, %v101_v15 }
  0xce   :  { %v367_v16 = vpop.f32.mrf.mxu1 }
  0xcf   :  { %395 = shalt.err (!%p392_p4)
}
  0xd0   :  { %s450_s26 = smov 128   ;;  %s451_s27 = smov 8   ;;  %193 = vst.msk [vmem:[#allocation4 + $0x8] sm:$0xff] %vm110_vm1, %v367_v16  ;;  %v183_v17 = vpop.f32.mrf.mxu1 }
  0xd1   :  { %286 = dma.vmem_to_hbm [thread:$0]  %s281_s23, 256, %s564_s4, [#allocation3], %s450_s26, %s450_s26, %s451_s27   ;;  %192 = vst.msk [vmem:[#allocation4] sm:$0xff] %vm110_vm1, %v183_v17 }
  0xd2   :  { %s452_s30 = smov [#allocation6]   ;;  %v378_v18 = vpop.f32.mrf.mxu0  ;;  %s404_s8 = scalar_lea.vmem %s293_s3, 256 }
  0xd3   :  { %s304_s7 = sshll.u32 %s452_s30, 4  ;;  %p405_p5 = scmp.ne.s32.totalorder %s293_s3, %s404_s8  ;;  %s305_s7 = int_to_ptr.vmem [resolvable:$true] %s304_s7 }
  0xd4   :  { %p409_p6 = scmp.lt.s32.totalorder %s293_s3, %s293_s3  ;;  %p410_p7 = scmp.lt.s32.totalorder %s404_s8, %s404_s8 }
  0xd6   :  { %p411_p8 = por %p410_p7, %p409_p6 }
  0xd8   :  { %p412_p9 = pnand %p411_p8, %p405_p5 }
  0xda   :  { %415 = shalt.err (!%p412_p9)
}
  0xdb   :  { %298 = dma.vmem_to_hbm [thread:$0]  %s293_s3, 256, %s565_s5, [#allocation5], %s450_s26, %s450_s26, %s451_s27   ;;  %274 = vst.msk [vmem:[#allocation6 + $0x8] sm:$0xff] %vm110_vm1, %v378_v18  ;;  %v264_v19 = vpop.f32.mrf.mxu0 }
  0xdc   :  { %273 = vst.msk [vmem:[#allocation6] sm:$0xff] %vm110_vm1, %v264_v19  ;;  %s424_s10 = scalar_lea.vmem %s305_s7, 256  ;;  %p429_p11 = scmp.lt.s32.totalorder %s305_s7, %s305_s7 }
  0xdd   :  { %p425_p10 = scmp.ne.s32.totalorder %s305_s7, %s424_s10  ;;  %p430_p12 = scmp.lt.s32.totalorder %s424_s10, %s424_s10 }
  0xdf   :  { %p431_p13 = por %p430_p12, %p429_p11 }
  0xe1   :  { %p432_p0 = pnand %p431_p13, %p425_p10 }
  0xe3   :  { %435 = shalt.err (!%p432_p0)
}
  0xe4   :  { %310 = dma.vmem_to_hbm [thread:$0]  %s305_s7, 256, %s566_s6, [#allocation5], %s450_s26, %s450_s26, %s451_s27  }
  0xe5   :  { %444 = dma.done.wait [#allocation3], 256  }
  0xe6   :  { %445 = vsyncadd [#allocation3], 4294967040 }
  0xe7   :  { %446 = dma.done.wait [#allocation5], 512  }
  0xe8   :  { %447 = vsyncadd [#allocation5], 4294966784 }
  0xe9   :  { %320 = vsyncpa [#allocation3], 1 }
  0xea   :  { %321 = vsyncpa [#allocation5], 1 }

</bundles_post_ra>
